<compile_context>
chip_gen: v7x
topology: tpu7x:2x2x1
jax: 0.10.0
libtpu: 0.0.40
codegen_flags: <defaults>
</compile_context>

<pallas_src>
import functools

import jax
import jax.numpy as jnp
from jax.experimental import pallas as pl
from jax.experimental.pallas import tpu as pltpu


def _round_up(n, m):
    return ((n + m - 1) // m) * m


# ---------------------------------------------------------------------------
# Fused single-pass kernel: one batch element, full (C, HW) block.
# ---------------------------------------------------------------------------
def _se_fused_kernel(x_ref, w1_ref, w2_ref, o_ref, *, inv_hw):
    # x_ref / o_ref: (C, HW) in the native dtype (leading batch dim squeezed).
    x = x_ref[...]                                                    # native dtype
    # Global average pool over spatial dim; accumulate in f32 for accuracy.
    pooled = jnp.sum(x, axis=1, keepdims=True, dtype=jnp.float32) * inv_hw   # (C, 1)
    # fc1 (1x1 conv, no bias) + ReLU : (hid, C) @ (C, 1) -> (hid, 1)
    h = jnp.maximum(
        jnp.dot(w1_ref[...], pooled, preferred_element_type=jnp.float32), 0.0)
    # fc2 (1x1 conv, no bias) + sigmoid : (C, hid) @ (hid, 1) -> (C, 1)
    s = jax.nn.sigmoid(
        jnp.dot(w2_ref[...], h, preferred_element_type=jnp.float32))        # (C, 1)
    # Channel-wise scale in the native dtype (no f32 copy of x).
    o_ref[...] = x * s.astype(x.dtype)


def _se_fused(x_flat, w1, w2):
    B, C, HW = x_flat.shape
    hid = w1.shape[0]
    itemsize = jnp.dtype(x_flat.dtype).itemsize
    kernel = functools.partial(_se_fused_kernel, inv_hw=1.0 / HW)
    return pl.pallas_call(
        kernel,
        out_shape=jax.ShapeDtypeStruct((B, C, HW), x_flat.dtype),
        grid_spec=pltpu.PrefetchScalarGridSpec(
            num_scalar_prefetch=0,
            grid=(B,),
            in_specs=[
                pl.BlockSpec((None, C, HW), lambda b: (b, 0, 0)),
                pl.BlockSpec((hid, C), lambda b: (0, 0)),
                pl.BlockSpec((C, hid), lambda b: (0, 0)),
            ],
            out_specs=pl.BlockSpec((None, C, HW), lambda b: (b, 0, 0)),
        ),
        compiler_params=pltpu.CompilerParams(
            dimension_semantics=("parallel",)),
        cost_estimate=pl.CostEstimate(
            flops=2 * B * C * HW + 4 * B * C * hid,
            transcendentals=B * C,
            bytes_accessed=2 * B * C * HW * itemsize),
    )(x_flat, w1, w2)


# ---------------------------------------------------------------------------
# Two-pass path (large C*HW): pass 1 = pool + FC + sigmoid, pass 2 = scale.
# ---------------------------------------------------------------------------
def _se_pool_fc_kernel(x_ref, w1_ref, w2_ref, s_ref, acc_ref, *, inv_hw):
    t = pl.program_id(1)

    @pl.when(t == 0)
    def _():
        acc_ref[...] = jnp.zeros_like(acc_ref)

    # Partial spatial sum for this HW tile, accumulated in f32.
    acc_ref[...] += jnp.sum(x_ref[...], axis=1, keepdims=True,
                            dtype=jnp.float32)                    # (C, 1)

    @pl.when(t == pl.num_programs(1) - 1)
    def _():
        pooled = acc_ref[...] * inv_hw                            # (C, 1) f32
        h = jnp.maximum(
            jnp.dot(w1_ref[...], pooled, preferred_element_type=jnp.float32),
            0.0)
        s_ref[...] = jax.nn.sigmoid(
            jnp.dot(w2_ref[...], h, preferred_element_type=jnp.float32))


def _se_scale_kernel(x_ref, s_ref, o_ref):
    # x_ref/o_ref: (C, TILE) native dtype; s_ref: (C, 1) f32.
    o_ref[...] = x_ref[...] * s_ref[...].astype(o_ref.dtype)


def _se_two_pass(x_flat, w1, w2, vmem_block_budget):
    B, C, HW = x_flat.shape
    hid = w1.shape[0]
    dtype = x_flat.dtype
    itemsize = jnp.dtype(dtype).itemsize

    # Lane-dense tile (multiple of 128) sized so in+out double-buffered blocks
    # stay within the budget.
    t_max = vmem_block_budget // (4 * C * itemsize)
    t_max = max(128, (t_max // 128) * 128)
    tile = min(t_max, _round_up(HW, 128))
    hw_pad = _round_up(HW, tile)
    n_tiles = hw_pad // tile

    if hw_pad != HW:
        # Zero padding keeps the pooled *sum* exact (we divide by the true HW).
        x_flat = jnp.pad(x_flat, ((0, 0), (0, 0), (0, hw_pad - HW)))

    # ---- Pass 1: pooled sums over spatial tiles, finalize fc1->relu->fc2->sigmoid.
    pool_kernel = functools.partial(_se_pool_fc_kernel, inv_hw=1.0 / HW)
    s = pl.pallas_call(
        pool_kernel,
        out_shape=jax.ShapeDtypeStruct((B, C, 1), jnp.float32),
        grid_spec=pltpu.PrefetchScalarGridSpec(
            num_scalar_prefetch=0,
            grid=(B, n_tiles),
            in_specs=[
                pl.BlockSpec((None, C, tile), lambda b, t: (b, 0, t)),
                pl.BlockSpec((hid, C), lambda b, t: (0, 0)),
                pl.BlockSpec((C, hid), lambda b, t: (0, 0)),
            ],
            out_specs=pl.BlockSpec((None, C, 1), lambda b, t: (b, 0, 0)),
            scratch_shapes=[pltpu.VMEM((C, 1), jnp.float32)],
        ),
        compiler_params=pltpu.CompilerParams(
            dimension_semantics=("parallel", "arbitrary")),
        cost_estimate=pl.CostEstimate(
            flops=B * C * hw_pad + 4 * B * C * hid,
            transcendentals=B * C,
            bytes_accessed=B * C * hw_pad * itemsize),
    )(x_flat, w1, w2)

    # ---- Pass 2: channel-wise scaling, fully parallel (megacore-friendly) grid.
    out = pl.pallas_call(
        _se_scale_kernel,
        out_shape=jax.ShapeDtypeStruct((B, C, hw_pad), dtype),
        grid_spec=pltpu.PrefetchScalarGridSpec(
            num_scalar_prefetch=0,
            grid=(B, n_tiles),
            in_specs=[
                pl.BlockSpec((None, C, tile), lambda b, t: (b, 0, t)),
                pl.BlockSpec((None, C, 1), lambda b, t: (b, 0, 0)),
            ],
            out_specs=pl.BlockSpec((None, C, tile), lambda b, t: (b, 0, t)),
        ),
        compiler_params=pltpu.CompilerParams(
            dimension_semantics=("parallel", "parallel")),
        cost_estimate=pl.CostEstimate(
            flops=B * C * hw_pad,
            transcendentals=0,
            bytes_accessed=2 * B * C * hw_pad * itemsize),
    )(x_flat, s)

    return out[:, :, :HW] if hw_pad != HW else out


# ---------------------------------------------------------------------------
# Public wrapper
# ---------------------------------------------------------------------------
# Conservative: keeps double-buffered in+out blocks well within the scoped VMEM
# defaults of all generations (16 MiB v5e, 32 MiB v6e/v7x).  Tune per-chip
# (and add vmem_limit_bytes) if larger blocks are wanted on v6e.
_DEFAULT_VMEM_BLOCK_BUDGET = 8 * 1024 * 1024


def se_attention(x, w1, w2, *, vmem_block_budget=_DEFAULT_VMEM_BLOCK_BUDGET,
                 force_two_pass=False):
    """SE forward.  x: (B, C, H, W); w1: (C//r, C); w2: (C, C//r)."""
    B, C, H, W = x.shape
    HW = H * W
    itemsize = jnp.dtype(x.dtype).itemsize
    x_flat = x.reshape(B, C, HW)

    # in + out blocks, each double-buffered -> 4 live copies of C*HW*itemsize.
    fused_block_bytes = 4 * C * HW * itemsize
    if fused_block_bytes <= vmem_block_budget and not force_two_pass:
        out_flat = _se_fused(x_flat, w1, w2)          # 1 read + 1 write of x
    else:
        out_flat = _se_two_pass(x_flat, w1, w2, vmem_block_budget)  # 2 reads + 1 write
    return out_flat.reshape(B, C, H, W)


def se_attention_ref(x, w1, w2):
    """Pure-JAX reference mirroring the PyTorch forward."""
    pooled = jnp.mean(x.astype(jnp.float32), axis=(2, 3))           # (B, C)
    h = jnp.maximum(pooled @ w1.astype(jnp.float32).T, 0.0)         # (B, hid)
    s = jax.nn.sigmoid(h @ w2.astype(jnp.float32).T)                # (B, C)
    return x * s[:, :, None, None].astype(x.dtype)


if __name__ == "__main__":
    key = jax.random.PRNGKey(0)
    kx, k1, k2, kx2 = jax.random.split(key, 4)

    # Small shapes consistent with the module (channels divisible by reduction=16).
    B, C, H, W, reduction = 2, 64, 16, 16, 16
    hid = C // reduction

    x = jax.random.normal(kx, (B, C, H, W), dtype=jnp.float32)
    w1 = jax.random.normal(k1, (hid, C), dtype=jnp.float32) * 0.1   # conv1: C -> C//r
    w2 = jax.random.normal(k2, (C, hid), dtype=jnp.float32) * 0.1   # conv2: C//r -> C

    ref = se_attention_ref(x, w1, w2)

    # Fused single-pass path (HW = 256, lane dense).
    out = jax.block_until_ready(se_attention(x, w1, w2))
    assert jnp.allclose(out, ref, atol=1e-5, rtol=1e-5), "fused f32 mismatch"

    # Two-pass path on the same inputs (forced).
    out2 = jax.block_until_ready(se_attention(x, w1, w2, force_two_pass=True))
    assert jnp.allclose(out2, ref, atol=1e-5, rtol=1e-5), "two-pass f32 mismatch"

    # bf16 input with a non-multiple-of-128 spatial size (10x10 = 100):
    # exercises the native-dtype multiply and the zero-padded tiling path.
    Hb = Wb = 10
    xb = jax.random.normal(kx2, (B, C, Hb, Wb), dtype=jnp.float32).astype(jnp.bfloat16)
    refb = se_attention_ref(xb, w1, w2).astype(jnp.float32)

    outb = jax.block_until_ready(se_attention(xb, w1, w2))
    assert jnp.allclose(outb.astype(jnp.float32), refb, atol=5e-2, rtol=5e-2), \
        "fused bf16 mismatch"

    outb2 = jax.block_until_ready(se_attention(xb, w1, w2, force_two_pass=True))
    assert jnp.allclose(outb2.astype(jnp.float32), refb, atol=5e-2, rtol=5e-2), \
        "two-pass bf16 mismatch"

    print("KERNEL_OK")
</pallas_src>

<mosaic_0001>
module attributes {stable_mosaic.version = 11 : i64} {
  func.func @_se_fused_kernel(%arg0: i32, %arg1: memref<1x64x256xf32, #tpu.memory_space<vmem>>, %arg2: memref<4x64xf32, #tpu.memory_space<vmem>>, %arg3: memref<64x4xf32, #tpu.memory_space<vmem>>, %arg4: memref<1x64x256xf32, #tpu.memory_space<vmem>>) attributes {dimension_semantics = [#tpu.dimension_semantics<parallel>], iteration_bounds = array<i64: 2>, scalar_prefetch = 0 : i64, scratch_operands = 0 : i64, tpu.core_type = #tpu.core_type<tc>, window_params = [{transform_indices = @transform_0, window_bounds = array<i64: 1, 64, 256>}, {pipeline_mode = #tpu.pipeline_mode<synchronous>, transform_indices = @transform_1, window_bounds = array<i64: 4, 64>}, {pipeline_mode = #tpu.pipeline_mode<synchronous>, transform_indices = @transform_2, window_bounds = array<i64: 64, 4>}, {transform_indices = @transform_3, window_bounds = array<i64: 1, 64, 256>}]} {
    %c0 = arith.constant 0 : index
    %c0_0 = arith.constant 0 : index
    %c0_1 = arith.constant 0 : index
    %0 = vector.load %arg1[%c0, %c0_0, %c0_1] : memref<1x64x256xf32, #tpu.memory_space<vmem>>, vector<1x64x256xf32>
    %1 = vector.shape_cast %0 : vector<1x64x256xf32> to vector<64x256xf32>
    %cst = arith.constant dense<0.000000e+00> : vector<64xf32>
    %2 = vector.multi_reduction <add>, %1, %cst [1] : vector<64x256xf32> to vector<64xf32>
    %3 = vector.shape_cast %2 : vector<64xf32> to vector<64x1xf32>
    %cst_2 = arith.constant 3.906250e-03 : f32
    %4 = vector.broadcast %cst_2 : f32 to vector<64x1xf32>
    %5 = arith.mulf %3, %4 : vector<64x1xf32>
    %c0_3 = arith.constant 0 : index
    %c0_4 = arith.constant 0 : index
    %6 = vector.load %arg2[%c0_3, %c0_4] : memref<4x64xf32, #tpu.memory_space<vmem>>, vector<4x64xf32>
    %cst_5 = arith.constant dense<0.000000e+00> : vector<4x1xf32>
    %7 = tpu.matmul %6, %5, %cst_5 {dimension_numbers = #tpu.dot_dimension_numbers<[1], [0], [0], [1], [0, 0, 1, 1], [], []>} : vector<4x64xf32>, vector<64x1xf32>, vector<4x1xf32> -> vector<4x1xf32>
    %cst_6 = arith.constant 0.000000e+00 : f32
    %8 = vector.broadcast %cst_6 : f32 to vector<4x1xf32>
    %9 = arith.maximumf %7, %8 : vector<4x1xf32>
    %c0_7 = arith.constant 0 : index
    %c0_8 = arith.constant 0 : index
    %10 = vector.load %arg3[%c0_7, %c0_8] : memref<64x4xf32, #tpu.memory_space<vmem>>, vector<64x4xf32>
    %cst_9 = arith.constant dense<0.000000e+00> : vector<64x1xf32>
    %11 = tpu.matmul %10, %9, %cst_9 {dimension_numbers = #tpu.dot_dimension_numbers<[1], [0], [0], [1], [0, 0, 1, 1], [], []>} : vector<64x4xf32>, vector<4x1xf32>, vector<64x1xf32> -> vector<64x1xf32>
    %12 = arith.negf %11 : vector<64x1xf32>
    %13 = math.exp %12 : vector<64x1xf32>
    %cst_10 = arith.constant 1.000000e+00 : f32
    %14 = vector.broadcast %cst_10 : f32 to vector<64x1xf32>
    %15 = arith.addf %14, %13 : vector<64x1xf32>
    %16 = arith.divf %14, %15 : vector<64x1xf32>
    %17 = vector.broadcast %16 : vector<64x1xf32> to vector<64x256xf32>
    %18 = arith.mulf %1, %17 : vector<64x256xf32>
    %c0_11 = arith.constant 0 : index
    %c0_12 = arith.constant 0 : index
    %c0_13 = arith.constant 0 : index
    %19 = vector.load %arg4[%c0_11, %c0_12, %c0_13] : memref<1x64x256xf32, #tpu.memory_space<vmem>>, vector<1x64x256xf32>
    %20 = vector.shape_cast %19 : vector<1x64x256xf32> to vector<64x256xf32>
    %21 = vector.shape_cast %18 : vector<64x256xf32> to vector<1x64x256xf32>
    tpu.vector_store %arg4[%c0_11, %c0_12, %c0_13], %21 {strides = array<i32>} : memref<1x64x256xf32, #tpu.memory_space<vmem>>, vector<1x64x256xf32>,
    return
  }
  func.func @transform_0(%arg0: i32) -> (i32, i32, i32) {
    %c0_i32 = arith.constant 0 : i32
    %c0_i32_0 = arith.constant 0 : i32
    %c0_i32_1 = arith.constant 0 : i32
    return %arg0, %c0_i32, %c0_i32_0 : i32, i32, i32
  }
  func.func @transform_1(%arg0: i32) -> (i32, i32) {
    %c0_i32 = arith.constant 0 : i32
    %c0_i32_0 = arith.constant 0 : i32
    %c0_i32_1 = arith.constant 0 : i32
    return %c0_i32, %c0_i32_0 : i32, i32
  }
  func.func @transform_2(%arg0: i32) -> (i32, i32) {
    %c0_i32 = arith.constant 0 : i32
    %c0_i32_0 = arith.constant 0 : i32
    %c0_i32_1 = arith.constant 0 : i32
    return %c0_i32, %c0_i32_0 : i32, i32
  }
  func.func @transform_3(%arg0: i32) -> (i32, i32, i32) {
    %c0_i32 = arith.constant 0 : i32
    %c0_i32_0 = arith.constant 0 : i32
    %c0_i32_1 = arith.constant 0 : i32
    return %arg0, %c0_i32, %c0_i32_0 : i32, i32, i32
  }
}

</mosaic_0001>

<bundles_post_ra>
// kernel: tpu_custom_call.1
= control target key start
LH: loop header
LB: loop body
LE: loop exit
PB: predicated region body
PF: predicated region fallthrough
CT: control target
= control target key end

     0   :  { %8 = vsyncpa [#allocation3], 0  ;;  %s1259_s0 = inlined_call_operand.hbm [shape: f32[2,64,256], index: 0, kind: input, shape index: {}]   ;;  %s1260_s1 = inlined_call_operand.vmem [shape: f32[4,64], index: 1, kind: input, shape index: {}]   ;;  %s1261_s2 = inlined_call_operand.vmem [shape: f32[64,4], index: 2, kind: input, shape index: {}]   ;;  %s1262_s3 = inlined_call_operand.hbm [shape: f32[2,64,256], index: 3, kind: output, shape index: {}]  }
   0x1   :  { %10 = vsyncpa [#allocation3 + $0x1], 0 }
   0x2   :  { %11 = vsyncpa [#allocation4], 0 }
   0x3   :  { %13 = vsyncpa [#allocation4 + $0x1], 0  ;;  %s975_s12 = smov 0   ;;  %s977_s13 = smov 0  }
   0x4   :  { %s979_s14 = smov 0   ;;  %s981_s15 = smov 0  }
   0x5 LB: > { %s996_s16 = sadd.s32 4294967295, %s943_s15   ;;  %s662_s17 = sadd.s32 4294967294, %s943_s15   ;;  %s943_s15 = sphi %s981_s15, %s1275_s15   ;;  %s939_s14 = sphi %s979_s14, %s1274_s14   ;;  %s935_s13 = sphi %s977_s13, %s1273_s13   ;;  %s931_s12 = sphi %s975_s12, %s1272_s12  }
   0x6   : > { %s1000_s18 = sadd.s32 1, %s943_s15   ;;  %s26_s19 = sadd.s32 1, %s939_s14 }
   0x7   : > { %s23_s20 = ssub.s32 %s943_s15, %s1000_s18  ;;  %p33_p0 = scmp.ne.s32.totalorder %s939_s14, %s935_s13 }
   0x8   : > { %p24_p1 = scmp.eq.s32.totalorder %s23_s20, 0  ;;  %p34_p2 = scmp.eq.s32.totalorder %s943_s15, 0 }
   0x9   : > { %p39_p3 = scmp.ne.s32.totalorder %s935_s13, %s931_s12  ;;  %p40_p4 = scmp.eq.s32.totalorder %s996_s16, 0 }
   0xa   : > { %s1012_s21 = scalar_select %p24_p1, %s939_s14, %s26_s19  }
   0xb   : > { %p1014_p5 = por %p34_p2, %p33_p0  ;;  %p1018_p6 = por %p40_p4, %p39_p3 }
   0xc   : > { %p105_p7 = scmp.eq.s32.totalorder %s996_s16, 1  ;;  %p111_p8 = scmp.eq.s32.totalorder %s662_s17, 1 }
   0xd   : > { %p771_p10 = scmp.lt.s32.totalorder %s943_s15, 2  ;;  %s137_s26 = sand.u32 1, %s939_s14  }
   0xe   : > { %p1025_p11 = por %p105_p7, %p33_p0  ;;  %p1029_p12 = por %p111_p8, %p39_p3 }
   0xf   : > { %s694_s27 = sshll.u32 %s943_s15, 11  ;;  %s665_s28 = sshll.u32 %s137_s26, 7 }
  0x10   : > { %s1266_s24 = scalar_select %p1025_p11, 1, 0 }
  0x11   : > { %s1267_s25 = scalar_select %p1029_p12, 1, 0 }
  0x12   : > { %s1038_s4 = scalar_lea.hbm %s1259_s0, %s694_s27  ;;  %s141_s5 = scalar_lea.vmem [#allocation2], %s665_s28 }
  0x13   : > { %s148_s6 = sshll.u32 %s141_s5, 4  ;;  %p1042_p13 = pnand %p771_p10, %p1014_p5  ;;  %s1046_s6 = int_to_ptr.vmem [resolvable:$true] %s148_s6 }
  0x14   : > { %s1048_s8 = scalar_lea.sflag [#allocation3], %s137_s26  ;;  %s847_s9 = scalar_lea.hbm %s1038_s4, 2048 }
  0x15   : > { %p848_p0 = scmp.ne.s32.totalorder %s1038_s4, %s847_s9  ;;  %p849_p1 = pneg %p1042_p13 }
  0x16   : > { %s852_s17 = scalar_lea.hbm %s1259_s0, 4096  ;;  %p853_p4 = scmp.lt.u32.totalorder %s1038_s4, %s1259_s0 }
  0x17   : > { %p850_p2 = pnand %p849_p1, %p848_p0  ;;  %p854_p5 = scmp.lt.u32.totalorder %s852_s17, %s847_s9 }
  0x18   : > { %p856_p8 = scmp.lt.u32.totalorder %s847_s9, %s1038_s4 }
  0x19   : > { %p851_p3 = pneg %p850_p2  ;;  %p855_p7 = por %p854_p5, %p853_p4 }
  0x1b   : > { %p857_p10 = por %p856_p8, %p855_p7 }
  0x1d   : > { %p858_p9 = pnand %p857_p10, %p851_p3 }
  0x1f   : > { %861 = shalt.err (!%p858_p9)
}
  0x20   : > { %s862_s22 = scalar_lea.vmem %s1046_s6, 2048  ;;  %s945_s26 = smov [#allocation2]  }
  0x21   : > { %p863_p0 = scmp.ne.s32.totalorder %s1046_s6, %s862_s22  ;;  %s867_s27 = sshll.u32 %s945_s26, 4  ;;  %s868_s27 = int_to_ptr.vmem [resolvable:$false] %s867_s27 }
  0x22   : > { %s869_s28 = scalar_lea.vmem %s868_s27, 4096  ;;  %p870_p11 = scmp.lt.s32.totalorder %s1046_s6, %s868_s27 }
  0x23   : > { %p865_p2 = pnand %p863_p0, %p849_p1  ;;  %p871_p4 = scmp.lt.s32.totalorder %s869_s28, %s862_s22 }
  0x25   : > { %p866_p12 = pneg %p865_p2  ;;  %p872_p5 = por %p871_p4, %p870_p11 }
  0x27   : > { %p873_p7 = pnand %p872_p5, %p866_p12 }
  0x29   : > { %876 = shalt.err (!%p873_p7)
}
  0x2a   : > { %s946_s29 = smov 256   ;;  %s947_s30 = smov 16  }
  0x2b   : > { %766 = dma.hbm_to_vmem [thread:$0]  (!%p1042_p13), %s1038_s4, 2048, %s1046_s6, %s1048_s8, %s946_s29, %s946_s29, %s947_s30  }
  0x2c   : > { %p668_p9 = scmp.ge.s32.totalorder %s943_s15, 1  ;;  %p156_p1 = scmp.lt.s32.totalorder %s943_s15, 3 }
  0x2e   : > { %p157_p3 = pnand %p668_p9, %p156_p1 }
  0x2f   : > { %s1079_s5 = sand.u32 (!%p157_p3), 1, %s935_s13  }
  0x30   : > { %160 = sbr.rel (%p157_p3) target bundleno = 848 (0x350), region = 32  ;;  %s669_s9 = sshll.u32 (!%p157_p3), %s1079_s5, 7 }
  0x31   : > { %s163_s10 = scalar_lea.sflag (!%p157_p3), [#allocation3], %s1079_s5  ;;  %s166_s11 = scalar_lea.vmem (!%p157_p3), [#allocation2], %s669_s9 }
  0x37   : > { %922 = dma.done.wait (%p1018_p6), %s163_s10, 2048  }
  0x38   : > { %924 = vsyncadd (%p1018_p6), %s163_s10, 4294965248  ;;  %v1089_v0 = vld [vmem:[%s166_s11 + $0x20] sm:$0xff]  ;;  %v1091_v1 = vld [vmem:[%s166_s11 + $0x28] sm:$0xff]  ;;  %v948_v24 = vmov 0.0|0.0   ;;  %vm949_vm0 = vmmov 0   ;;  %v950_v25 = vmov 0.0  }
  0x39   : > { %v1093_v2 = vld [vmem:[%s166_s11] sm:$0xff]  ;;  %v211_v3 = vadd.f32 %v1091_v1, %v1089_v0  ;;  %v1097_v4 = vld [vmem:[%s166_s11 + $0x8] sm:$0xff]  ;;  %v1099_v5 = vld [vmem:[%s166_s11 + $0x30] sm:$0xff]  ;;  %747 = vmatprep.subr.bf16.mxu0 %v948_v24  ;;  %730 = vmatprep.mubr.msk.f32.mxu0 %vm949_vm0, %v950_v25  ;;  %vm238_vm1 = vcmask 523264   ;;  %vm321_vm2 = vcmask 31744   ;;  %vm346_vm3 = vcmask 1043456  }
  0x3a   : > { %v1101_v6 = vld [vmem:[%s166_s11 + $0x38] sm:$0xff]  ;;  %v205_v7 = vadd.f32 %v1097_v4, %v1093_v2  ;;  %v1105_v8 = vld [vmem:[%s166_s11 + $0x10] sm:$0xff]  ;;  %v1117_v14 = vld [vmem:[%s166_s11 + $0x40] sm:$0xff]  ;;  %v951_v58 = vmov 0   ;;  %s1178_s6 = scalar_lea.vmem [#allocation5], %s669_s9  ;;  %s695_s9 = sshll.u32 %s996_s16, 11 }
  0x3b   : > { %v1107_v9 = vld [vmem:[%s166_s11 + $0x18] sm:$0xff]  ;;  %212 = vadd.xlane.f32.xlu1 %v211_v3  ;;  %v214_v10 = vadd.f32 %v1101_v6, %v1099_v5  ;;  %v1113_v12 = vld [vmem:[%s166_s11 + $0x50] sm:$0xff]  ;;  %v1119_v15 = vld [vmem:[%s166_s11 + $0x48] sm:$0xff]  ;;  %813 = vset.pattern.permute.xlu0 %v951_v58  ;;  %s589_s7 = sshll.u32 %s1178_s6, 4  ;;  %s1209_s19 = scalar_lea.hbm %s1262_s3, %s695_s9  ;;  %s1211_s7 = int_to_ptr.vmem [resolvable:$true] %s589_s7 }
  0x3c   : > { %206 = vadd.xlane.f32.xlu0 %v205_v7  ;;  %v208_v11 = vadd.f32 %v1107_v9, %v1105_v8  ;;  %v1115_v13 = vld [vmem:[%s166_s11 + $0x58] sm:$0xff]  ;;  %v217_v17 = vadd.f32 %v1119_v15, %v1117_v14  ;;  %v1125_v18 = vld [vmem:[%s166_s11 + $0x70] sm:$0xff]  ;;  %v1129_v20 = vld [vmem:[%s166_s11 + $0x60] sm:$0xff]  ;;  %814 = vset.pattern.permute.xlu1 %v951_v58  ;;  %s576_s16 = scalar_lea.sflag [#allocation4], %s1079_s5  ;;  %s877_s20 = scalar_lea.vmem %s1211_s7, 2048 }
  0x3d   : > { %v220_v16 = vadd.f32 %v1115_v13, %v1113_v12  ;;  %v1127_v19 = vld [vmem:[%s166_s11 + $0x78] sm:$0xff]  ;;  %v1131_v21 = vld [vmem:[%s166_s11 + $0x68] sm:$0xff]  ;;  %v237_v46 = vld [vmem:[%s1260_s1] sm:$0xf]  ;;  %p878_p6 = scmp.ne.s32.totalorder %s1211_s7, %s877_s20  ;;  %p1269_p11 = scmp.ne.s32.totalorder %s1266_s24, 0 }
  0x3e   : > { %v226_v22 = vadd.f32 %v1127_v19, %v1125_v18  ;;  %v223_v23 = vadd.f32 %v1131_v21, %v1129_v20  ;;  %v313_v47 = vld [vmem:[%s1261_s2] sm:$0xff]  ;;  %v314_v51 = vld [vmem:[%s1261_s2 + $0x8] sm:$0xff]  ;;  %v315_v52 = vld [vmem:[%s1261_s2 + $0x10] sm:$0xff]  ;;  %s952_s22 = smov [#allocation5]  }
  0x3f   : > { %215 = vadd.xlane.f32.xlu1 %v214_v10  ;;  %735 = vmatprep.mubr.msk.f32.mxu1 %vm321_vm2, %v313_v47  ;;  %v316_v53 = vld [vmem:[%s1261_s2 + $0x18] sm:$0xff]  ;;  %v317_v54 = vld [vmem:[%s1261_s2 + $0x20] sm:$0xff]  ;;  %v318_v55 = vld [vmem:[%s1261_s2 + $0x28] sm:$0xff]  ;;  %p879_p12 = pnand %p878_p6, %p1269_p11  ;;  %s881_s26 = sshll.u32 %s952_s22, 4  ;;  %s882_s26 = int_to_ptr.vmem [resolvable:$false] %s881_s26 }
  0x40   : > { %209 = vadd.xlane.f32.xlu0 %v208_v11  ;;  %v319_v56 = vld [vmem:[%s1261_s2 + $0x30] sm:$0xff]  ;;  %v320_v57 = vld [vmem:[%s1261_s2 + $0x38] sm:$0xff]  ;;  %s883_s27 = scalar_lea.vmem %s882_s26, 4096  ;;  %p884_p8 = scmp.lt.s32.totalorder %s1211_s7, %s882_s26 }
  0x41   : > { %p880_p13 = pneg %p879_p12  ;;  %p885_p10 = scmp.lt.s32.totalorder %s883_s27, %s877_s20 }
  0x43   : > { %221 = vadd.xlane.f32.xlu1 %v220_v16  ;;  %p886_p0 = por %p885_p10, %p884_p8 }
  0x44   : > { %218 = vadd.xlane.f32.xlu0 %v217_v17 }
  0x45   : > { %p887_p2 = pnand %p886_p0, %p880_p13 }
  0x47   : > { %227 = vadd.xlane.f32.xlu1 %v226_v22 }
  0x48   : > { %224 = vadd.xlane.f32.xlu0 %v223_v23 }
  0xc8   : > { %v213_v26 = vpop.xlane.xlu1 %212 }
  0xc9   : > { %v207_v27 = vpop.xlane.xlu0 %206  ;;  %v231_v32 = vmul.f32 0.00390625, %v213_v26 }
  0xca   : > { %v229_v30 = vmul.f32 0.00390625, %v207_v27 }
  0xcc   : > { %v216_v28 = vpop.xlane.xlu1 %215 }
  0xcd   : > { %v210_v29 = vpop.xlane.xlu0 %209  ;;  %v232_v33 = vmul.f32 0.00390625, %v216_v28 }
  0xce   : > { %v230_v31 = vmul.f32 0.00390625, %v210_v29 }
  0xcf   : > { %v751_v39 = vpack.c.bf16 %v232_v33, %v231_v32 }
  0xd0   : > { %v748_v34 = vpack.c.bf16 %v230_v31, %v229_v30  ;;  %v222_v35 = vpop.xlane.xlu1 %221 }
  0xd1   : > { %v219_v36 = vpop.xlane.xlu0 %218  ;;  %v234_v37 = vmul.f32 0.00390625, %v222_v35 }
  0xd2   : > { %749 = vmatpush3.bf16.msra.mxu0 %v748_v34  ;;  %v233_v38 = vmul.f32 0.00390625, %v219_v36 }
  0xd3   : > { %750 = vmatprep.subr.bf16.mxu0 %v948_v24 }
  0xd4   : > { %v228_v40 = vpop.xlane.xlu1 %227  ;;  %v754_v42 = vpack.c.bf16 %v234_v37, %v233_v38 }
  0xd5   : > { %v225_v41 = vpop.xlane.xlu0 %224  ;;  %v236_v43 = vmul.f32 0.00390625, %v228_v40 }
  0xd6   : > { %752 = vmatpush3.bf16.msra.mxu0 %v751_v39  ;;  %v235_v44 = vmul.f32 0.00390625, %v225_v41 }
  0xd7   : > { %753 = vmatprep.subr.bf16.mxu0 %v948_v24 }
  0xd8   : > { %v757_v45 = vpack.c.bf16 %v236_v43, %v235_v44 }
  0xda   : > { %755 = vmatpush3.bf16.msra.mxu0 %v754_v42 }
  0xdb   : > { %756 = vmatprep.subr.bf16.mxu0 %v948_v24 }
  0xde   : > { %758 = vmatpush3.bf16.msra.mxu0 %v757_v45 }
  0xe1   : > { %731 = vmatmul.mubr.msk.f32.vlgmr.msra.gmra.mrb[0].mxu0 %vm238_vm1, %v237_v46 }
 0x1b4   : > { %v308_v48 = vpop.f32.mrb[0].mxu0 }
 0x1b5   : > { %v312_v49 = vmax.f32 %v308_v48, 0.0  ;;  %v732_v50 = vpop.f32.mrb[1].mxu0 }
 0x1b7   : > { %733 = vmatprep.subr.msk.mxu1 %vm346_vm3, %v312_v49 }
 0x1b8   : > { %734 = vmatpush3.msk.msra.mxu1 %vm346_vm3, %v312_v49 }
 0x1b9   : > { %736 = vmatmul.mubr.msk.f32.vlgmr.msra.gmra.mrb[0].mxu1 %vm321_vm2, %v314_v51 }
 0x1ba   : > { %738 = vmatprep.mubr.msk.f32.mxu1 %vm321_vm2, %v315_v52 }
 0x1bd   : > { %739 = vmatmul.mubr.msk.f32.gmra.mrb[2].mxu1 %vm321_vm2, %v316_v53 }
 0x1be   : > { %741 = vmatprep.mubr.msk.f32.mxu1 %vm321_vm2, %v317_v54 }
 0x1c1   : > { %742 = vmatmul.mubr.msk.f32.gmra.mrb[4].mxu1 %vm321_vm2, %v318_v55 }
 0x1c2   : > { %744 = vmatprep.mubr.msk.f32.mxu1 %vm321_vm2, %v319_v56 }
 0x1c5   : > { %745 = vmatmul.mubr.msk.f32.gmra.mrb[6].mxu1 %vm321_vm2, %v320_v57 }
 0x28c   : > { %v737_v59 = vpop.f32.mrb[0].mxu1 }
 0x28d   : > { %v682_v60 = vmul.f32 -1.442695, %v737_v59  ;;  %v416_v61 = vpop.f32.mrb[1].mxu1 }
 0x28e   : > { %v681_v62 = vmul.f32 -1.442695, %v416_v61 }
 0x28f   : > { %815 = vpow2.f32 %v682_v60 }
 0x290   : > { %817 = vpow2.f32 %v681_v62  ;;  %v740_v63 = vpop.f32.mrb[2].mxu1 }
 0x291   : > { %v684_v3 = vmul.f32 -1.442695, %v740_v63  ;;  %v426_v7 = vpop.f32.mrb[3].mxu1 }
 0x292   : > { %v683_v10 = vmul.f32 -1.442695, %v426_v7 }
 0x293   : > { %819 = vpow2.f32 %v684_v3 }
 0x294   : > { %821 = vpow2.f32 %v683_v10  ;;  %v743_v11 = vpop.f32.mrb[4].mxu1 }
 0x295   : > { %v686_v16 = vmul.f32 -1.442695, %v743_v11  ;;  %v436_v17 = vpop.f32.mrb[5].mxu1 }
 0x296   : > { %v685_v22 = vmul.f32 -1.442695, %v436_v17 }
 0x297   : > { %823 = vpow2.f32 %v686_v16 }
 0x298   : > { %v746_v23 = vpop.f32.mrb[6].mxu1  ;;  %825 = vpow2.f32 %v685_v22 }
 0x299   : > { %v816_v24 = vpop.eup %815  ;;  %v446_v25 = vpop.f32.mrb[7].mxu1  ;;  %v688_v33 = vmul.f32 -1.442695, %v746_v23 }
 0x29a   : > { %v818_v26 = vpop.eup %817  ;;  %v480_v27 = vadd.f32 1.0, %v816_v24  ;;  %v687_v28 = vmul.f32 -1.442695, %v446_v25 }
 0x29b   : > { %v479_v29 = vadd.f32 1.0, %v818_v26 }
 0x29c   : > { %827 = vrcp.f32 %v480_v27 }
 0x29d   : > { %v820_v30 = vpop.eup %819  ;;  %829 = vrcp.f32 %v479_v29 }
 0x29e   : > { %v822_v31 = vpop.eup %821  ;;  %v482_v32 = vadd.f32 1.0, %v820_v30  ;;  %831 = vpow2.f32 %v687_v28 }
 0x29f   : > { %v481_v34 = vadd.f32 1.0, %v822_v31 }
 0x2a0   : > { %833 = vrcp.f32 %v482_v32 }
 0x2a1   : > { %v824_v35 = vpop.eup %823  ;;  %835 = vpow2.f32 %v688_v33 }
 0x2a2   : > { %v484_v36 = vadd.f32 1.0, %v824_v35  ;;  %837 = vrcp.f32 %v481_v34  ;;  %v826_v37 = vpop.eup %825 }
 0x2a3   : > { %v483_v41 = vadd.f32 1.0, %v826_v37 }
 0x2a4   : > { %839 = vrcp.f32 %v484_v36 }
 0x2a5   : > { %841 = vrcp.f32 %v483_v41 }
 0x2a6   : > { %v828_v38 = vpop.eup %827 }
 0x2a7   : > { %v830_v39 = vpop.eup %829  ;;  %510 = vperm.xlu1 %814, %v828_v38  }
 0x2a8   : > { %v832_v40 = vpop.eup %831  ;;  %505 = vperm.xlu0 %813, %v830_v39  }
 0x2a9   : > { %v485_v43 = vadd.f32 1.0, %v832_v40 }
 0x2aa   : > { %v834_v42 = vpop.eup %833 }
 0x2ab   : > { %520 = vperm.xlu1 %814, %v834_v42   ;;  %v836_v44 = vpop.eup %835  ;;  %843 = vrcp.f32 %v485_v43 }
 0x2ac   : > { %v838_v45 = vpop.eup %837  ;;  %v486_v47 = vadd.f32 1.0, %v836_v44 }
 0x2ae   : > { %v840_v46 = vpop.eup %839  ;;  %845 = vrcp.f32 %v486_v47 }
 0x2af   : > { %515 = vperm.xlu1 %814, %v838_v45   ;;  %v842_v48 = vpop.eup %841 }
 0x2b3   : > { %530 = vperm.xlu1 %814, %v840_v46  }
 0x2b5   : > { %v844_v49 = vpop.eup %843 }
 0x2b7   : > { %525 = vperm.xlu1 %814, %v842_v48  }
 0x2b8   : > { %v846_v50 = vpop.eup %845 }
 0x2bb   : > { %535 = vperm.xlu1 %814, %v844_v49  }
 0x2bf   : > { %540 = vperm.xlu1 %814, %v846_v50  }
 0x326   : > { %v511_v51 = vpop.permute.xlu1 %510 }
 0x327   : > { %v545_v52 = vmul.f32 %v511_v51, %v1105_v8  ;;  %v546_v53 = vmul.f32 %v511_v51, %v1107_v9  ;;  %v506_v54 = vpop.permute.xlu0 %505 }
 0x328   : > { %v543_v55 = vmul.f32 %v506_v54, %v1093_v2  ;;  %v544_v56 = vmul.f32 %v506_v54, %v1097_v4 }
 0x329   : > { %561 = vst [vmem:[%s1178_s6 + $0x10] sm:$0xff] %v545_v52  ;;  %562 = vst [vmem:[%s1178_s6 + $0x18] sm:$0xff] %v546_v53 }
 0x32a   : > { %559 = vst [vmem:[%s1178_s6] sm:$0xff] %v543_v55  ;;  %560 = vst [vmem:[%s1178_s6 + $0x8] sm:$0xff] %v544_v56  ;;  %v521_v2 = vpop.permute.xlu1 %520 }
 0x32b   : > { %v549_v4 = vmul.f32 %v521_v2, %v1099_v5  ;;  %v550_v8 = vmul.f32 %v521_v2, %v1101_v6 }
 0x32d   : > { %565 = vst [vmem:[%s1178_s6 + $0x30] sm:$0xff] %v549_v4  ;;  %566 = vst [vmem:[%s1178_s6 + $0x38] sm:$0xff] %v550_v8 }
 0x32e   : > { %v516_v9 = vpop.permute.xlu1 %515 }
 0x32f   : > { %v547_v57 = vmul.f32 %v516_v9, %v1089_v0  ;;  %v548_v58 = vmul.f32 %v516_v9, %v1091_v1 }
 0x331   : > { %563 = vst [vmem:[%s1178_s6 + $0x20] sm:$0xff] %v547_v57  ;;  %564 = vst [vmem:[%s1178_s6 + $0x28] sm:$0xff] %v548_v58 }
 0x332   : > { %v531_v59 = vpop.permute.xlu1 %530 }
 0x333   : > { %v553_v5 = vmul.f32 %v531_v59, %v1113_v12  ;;  %v554_v6 = vmul.f32 %v531_v59, %v1115_v13 }
 0x335   : > { %569 = vst [vmem:[%s1178_s6 + $0x50] sm:$0xff] %v553_v5  ;;  %570 = vst [vmem:[%s1178_s6 + $0x58] sm:$0xff] %v554_v6 }
 0x336   : > { %v526_v60 = vpop.permute.xlu1 %525 }
 0x337   : > { %v551_v61 = vmul.f32 %v526_v60, %v1117_v14  ;;  %v552_v0 = vmul.f32 %v526_v60, %v1119_v15 }
 0x339   : > { %567 = vst [vmem:[%s1178_s6 + $0x40] sm:$0xff] %v551_v61  ;;  %568 = vst [vmem:[%s1178_s6 + $0x48] sm:$0xff] %v552_v0 }
 0x33a   : > { %v536_v1 = vpop.permute.xlu1 %535 }
 0x33b   : > { %v555_v62 = vmul.f32 %v536_v1, %v1129_v20  ;;  %v556_v12 = vmul.f32 %v536_v1, %v1131_v21 }
 0x33d   : > { %571 = vst [vmem:[%s1178_s6 + $0x60] sm:$0xff] %v555_v62  ;;  %572 = vst [vmem:[%s1178_s6 + $0x68] sm:$0xff] %v556_v12 }
 0x33e   : > { %v541_v13 = vpop.permute.xlu1 %540 }
 0x33f   : > { %v557_v14 = vmul.f32 %v541_v13, %v1125_v18  ;;  %v558_v15 = vmul.f32 %v541_v13, %v1127_v19 }
 0x341   : > { %573 = vst [vmem:[%s1178_s6 + $0x70] sm:$0xff] %v557_v14  ;;  %574 = vst [vmem:[%s1178_s6 + $0x78] sm:$0xff] %v558_v15 }
 0x342   : > { %890 = shalt.err (!%p887_p2)
}
 0x343   : > { %s891_s28 = scalar_lea.hbm %s1209_s19, 2048  ;;  %s895_s10 = scalar_lea.hbm %s1262_s3, 4096 }
 0x344   : > { %p892_p4 = scmp.ne.s32.totalorder %s1209_s19, %s891_s28  ;;  %p896_p9 = scmp.lt.u32.totalorder %s1209_s19, %s1262_s3 }
 0x345   : > { %p897_p1 = scmp.lt.u32.totalorder %s895_s10, %s891_s28  ;;  %p899_p6 = scmp.lt.u32.totalorder %s891_s28, %s1209_s19 }
 0x346   : > { %p893_p5 = pnand %p892_p4, %p1269_p11 }
 0x347   : > { %p898_p3 = por %p897_p1, %p896_p9 }
 0x348   : > { %p894_p7 = pneg %p893_p5 }
 0x349   : > { %p900_p12 = por %p899_p6, %p898_p3 }
 0x34b   : > { %p901_p13 = pnand %p900_p12, %p894_p7 }
 0x34d   : > { %904 = shalt.err (!%p901_p13)
}
 0x34e   : > { %s953_s4 = smov 256   ;;  %s954_s6 = smov 16  }
 0x34f   : > { %761 = dma.vmem_to_hbm [thread:$0]  (%p1269_p11), %s1211_s7, 2048, %s1209_s19, %s576_s16, %s953_s4, %s953_s4, %s954_s6  }
 0x350 PF: > { %s604_s9 = sand.u32 1, %s931_s12   ;;  %p1270_p8 = scmp.ne.s32.totalorder %s1267_s25, 0 }
 0x351   : > { %p1271_p10 = scmp.ge.s32.totalorder %s943_s15, 2  ;;  %s605_s8 = scalar_lea.sflag [#allocation4], %s604_s9 }
 0x353   : > { %p768_p0 = pnand %p1271_p10, %p1270_p8 }
 0x355   : > { %926 = dma.done.wait (!%p768_p0), %s605_s8, 2048  }
 0x356   : > { %928 = vsyncadd (!%p768_p0), %s605_s8, 4294965248  ;;  %p16_p2 = scmp.ge.s32.totalorder %s1000_s18, 4   ;;  %s1272_s12 = smov %s935_s13 }
 0x357   : > { %s1273_s13 = smov %s939_s14  ;;  %s1274_s14 = smov %s1012_s21 }
 0x358   : > { %s1275_s15 = smov %s1000_s18  ;;  %18 = sbr.rel (!%p16_p2) target bundleno = 5 (0x5), region = 77 }
 0x35f   :  { %610 = vsyncpa [#allocation3], 1 }
 0x360   :  { %612 = vsyncpa [#allocation3 + $0x1], 1 }
 0x361   :  { %613 = vsyncpa [#allocation4], 1 }
 0x362   :  { %615 = vsyncpa [#allocation4 + $0x1], 1 }

</bundles_post_ra>
